<compile_context>
chip_gen: v7x
topology: tpu7x:2x2x1
jax: 0.10.0
libtpu: 0.0.40
codegen_flags: <defaults>
</compile_context>

<pallas_src>
import functools

import jax
import jax.numpy as jnp
from jax.experimental import pallas as pl
from jax.experimental.pallas import tpu as pltpu


_HALO = 128          # lane-aligned halo width (covers any kernel_size - 1 <= 128)
_MAX_TILE_L = 512    # default lane tile (multiple of 128)


def _round_up(x, m):
    return ((x + m - 1) // m) * m


def _make_gconv1d_kernel(Cin_p, Cout_p, K, tile_l):
    """Kernel body. Layout: channels on sublanes, sequence length on lanes.

    One grid step = one (batch, L-tile) pair:
      * build an im2col RHS (K*Cin_p, tile_l) from K lane-shifted views of the
        input tile (+ 128-lane halo),
      * one MXU matmul against the fused (2*Cout_p, K*Cin_p) weight matrix
        produces BOTH branches for the whole tile,
      * f32 epilogue: bias + sigmoid gate, single unmasked lane-dense store.
    """

    def kernel(xa_ref, xb_ref, w_ref, b_ref, o_ref):
        xa = xa_ref[0]                                     # (Cin_p, tile_l)
        xb = xb_ref[0]                                     # (Cin_p, _HALO)
        x_ext = jnp.concatenate([xa, xb], axis=-1)         # (Cin_p, tile_l + _HALO)

        # im2col: row (k*Cin_p + c), col t  holds  x[c, t + k].
        rhs = jnp.concatenate(
            [x_ext[:, k:k + tile_l] for k in range(K)], axis=0)   # (K*Cin_p, tile_l)

        # Single fused MXU matmul (both branches, all K taps, K*Cin_p-deep
        # contraction), f32 accumulation.
        acc = jnp.dot(w_ref[...], rhs,
                      preferred_element_type=jnp.float32)         # (2*Cout_p, tile_l)

        # Epilogue in f32: bias, branch split (sublane-aligned at Cout_p),
        # sigmoid gate (exp -> EUP slot), one store.
        y = acc + b_ref[...]
        gate = jax.nn.sigmoid(y[Cout_p:, :])
        o_ref[0] = (y[:Cout_p, :] * gate).astype(o_ref.dtype)

    return kernel


@functools.partial(jax.jit, static_argnames=("compute_dtype", "tile_l"))
def gconv1d_forward(x, w1, b1, w2, b2, *, compute_dtype=jnp.float32, tile_l=None):
    """GConv1d forward: conv1(x) * sigmoid(conv2(x)).

    x:       (N, Cin, L) float32          (PyTorch NCL layout)
    w1, w2:  (Cout, Cin, K) float32       (PyTorch Conv1d weight layout)
    b1, b2:  (Cout,) float32
    compute_dtype: jnp.float32 or jnp.bfloat16 (MXU operands; accumulation,
                   bias and gate always in f32).
    returns: (N, Cout, L - K + 1) float32
    """
    N, Cin, L = x.shape
    Cout, Cin_w, K = w1.shape
    assert Cin_w == Cin, (Cin_w, Cin)
    L_out = L - K + 1
    assert L_out >= 1
    assert K - 1 <= _HALO, "kernel_size - 1 must fit in the 128-lane halo"

    # ---- static tiling decisions -------------------------------------------
    Cin_p = _round_up(Cin, 8)       # sublane-aligned channels (aligned im2col)
    Cout_p = _round_up(Cout, 8)     # branch split at Cout_p is sublane-aligned
    if tile_l is None:
        tile_l = min(_MAX_TILE_L, _round_up(L_out, 128))
    assert tile_l % 128 == 0
    num_l = pl.cdiv(L_out, tile_l)
    L_out_pad = num_l * tile_l
    L_x_pad = L_out_pad + _HALO     # last tile's halo block stays in bounds

    # ---- pack operands (one pad/copy of x; weights/bias are tiny) ----------
    xp = jnp.pad(x, ((0, 0), (0, Cin_p - Cin), (0, L_x_pad - L))).astype(compute_dtype)

    def pack_w(w):
        # (Cout, Cin, K) -> (Cout_p, K*Cin_p), col index = k*Cin_p + c.
        wt = jnp.transpose(w, (0, 2, 1))                       # (Cout, K, Cin)
        wt = jnp.pad(wt, ((0, Cout_p - Cout), (0, 0), (0, Cin_p - Cin)))
        return wt.reshape(Cout_p, K * Cin_p)

    w_all = jnp.concatenate([pack_w(w1), pack_w(w2)], axis=0).astype(compute_dtype)
    b_all = jnp.concatenate([
        jnp.pad(b1, (0, Cout_p - Cout)),
        jnp.pad(b2, (0, Cout_p - Cout)),
    ]).reshape(2 * Cout_p, 1).astype(jnp.float32)

    kernel = _make_gconv1d_kernel(Cin_p, Cout_p, K, tile_l)
    t128 = tile_l // 128

    out = pl.pallas_call(
        kernel,
        out_shape=jax.ShapeDtypeStruct((N, Cout_p, L_out_pad), jnp.float32),
        grid_spec=pltpu.PrefetchScalarGridSpec(
            num_scalar_prefetch=0,
            grid=(N, num_l),
            in_specs=[
                # Main input tile: columns [l*tile_l, (l+1)*tile_l).
                pl.BlockSpec((1, Cin_p, tile_l), lambda n, l: (n, 0, l)),
                # Halo: next 128 columns of the SAME array (covers taps 1..K-1).
                pl.BlockSpec((1, Cin_p, _HALO),
                             lambda n, l: (n, 0, (l + 1) * t128)),
                # Fused weights / bias: constant index map -> DMA'd once and
                # kept resident (the pipeline only re-copies on index change).
                pl.BlockSpec((2 * Cout_p, K * Cin_p), lambda n, l: (0, 0)),
                pl.BlockSpec((2 * Cout_p, 1), lambda n, l: (0, 0)),
            ],
            out_specs=pl.BlockSpec((1, Cout_p, tile_l), lambda n, l: (n, 0, l)),
        ),
        compiler_params=pltpu.CompilerParams(
            # Batch and L-tile axes are both independent -> megacore-parallel
            # on v7x even when N == 1.
            dimension_semantics=("parallel", "parallel"),
            # Explicit budget; per-step working set is far below this on all
            # of v5e / v6e / v7x with tile_l <= 512.
            vmem_limit_bytes=32 * 1024 * 1024,
        ),
    )(xp, xp, w_all, b_all)

    # Strip channel / length padding.
    return out[:, :Cout, :L_out]


# ----------------------------------------------------------------------------
# Pure-JAX reference (explicit VPU sum, no matmul-precision ambiguity) -- used
# only for checking the kernel.
# ----------------------------------------------------------------------------
def _ref_conv1d(x, w, b):
    N, Cin, L = x.shape
    Cout, _, K = w.shape
    L_out = L - K + 1
    acc = jnp.broadcast_to(b[None, :, None], (N, Cout, L_out)).astype(jnp.float32)
    for k in range(K):
        acc = acc + jnp.sum(
            x[:, None, :, k:k + L_out] * w[None, :, :, k, None], axis=2)
    return acc


def _ref_gconv1d(x, w1, b1, w2, b2):
    d1 = _ref_conv1d(x, w1, b1)
    d2 = _ref_conv1d(x, w2, b2)
    return d1 * jax.nn.sigmoid(d2)


if __name__ == "__main__":
    N, Cin, Cout, L, K = 2, 4, 8, 16, 3

    key = jax.random.PRNGKey(0)
    k1, k2, k3, k4, k5 = jax.random.split(key, 5)
    # Deterministic synthetic parameters (PyTorch Conv1d weight layout).
    w1 = jax.random.normal(k1, (Cout, Cin, K), jnp.float32) * 0.1
    b1 = jax.random.normal(k2, (Cout,), jnp.float32) * 0.1
    w2 = jax.random.normal(k3, (Cout, Cin, K), jnp.float32) * 0.1
    b2 = jax.random.normal(k4, (Cout,), jnp.float32) * 0.1
    x = jax.random.normal(k5, (N, Cin, L), jnp.float32)

    ref = _ref_gconv1d(x, w1, b1, w2, b2)

    # f32 operand path: tight (combined rel/abs) tolerance.
    out = jax.block_until_ready(gconv1d_forward(x, w1, b1, w2, b2))
    assert out.shape == (N, Cout, L - K + 1), out.shape
    err_f32 = float(jnp.max(jnp.abs(out - ref)))
    assert jnp.allclose(out, ref, rtol=1e-4, atol=1e-4), f"f32 mismatch, max_err={err_f32}"

    # bf16 operand path (f32 accumulation / epilogue): looser tolerance.
    out_bf16 = jax.block_until_ready(
        gconv1d_forward(x, w1, b1, w2, b2, compute_dtype=jnp.bfloat16))
    assert out_bf16.shape == (N, Cout, L - K + 1), out_bf16.shape
    err_bf16 = float(jnp.max(jnp.abs(out_bf16 - ref)))
    assert jnp.allclose(out_bf16, ref, rtol=3e-2, atol=3e-2), \
        f"bf16 mismatch, max_err={err_bf16}"

    print("KERNEL_OK")
</pallas_src>

<mosaic_0001>
module attributes {stable_mosaic.version = 11 : i64} {
  func.func @kernel(%arg0: i32, %arg1: i32, %arg2: memref<1x8x128xf32, #tpu.memory_space<vmem>>, %arg3: memref<1x8x128xf32, #tpu.memory_space<vmem>>, %arg4: memref<16x24xf32, #tpu.memory_space<vmem>>, %arg5: memref<16x1xf32, #tpu.memory_space<vmem>>, %arg6: memref<1x8x128xf32, #tpu.memory_space<vmem>>) attributes {dimension_semantics = [#tpu.dimension_semantics<parallel>, #tpu.dimension_semantics<parallel>], iteration_bounds = array<i64: 2, 1>, scalar_prefetch = 0 : i64, scratch_operands = 0 : i64, tpu.core_type = #tpu.core_type<tc>, window_params = [{transform_indices = @transform_0, window_bounds = array<i64: 1, 8, 128>}, {transform_indices = @transform_1, window_bounds = array<i64: 1, 8, 128>}, {pipeline_mode = #tpu.pipeline_mode<synchronous>, transform_indices = @transform_2, window_bounds = array<i64: 16, 24>}, {pipeline_mode = #tpu.pipeline_mode<synchronous>, transform_indices = @transform_3, window_bounds = array<i64: 16, 1>}, {transform_indices = @transform_4, window_bounds = array<i64: 1, 8, 128>}]} {
    %c0 = arith.constant 0 : index
    %c0_0 = arith.constant 0 : index
    %c0_1 = arith.constant 0 : index
    %0 = vector.load %arg2[%c0, %c0_0, %c0_1] : memref<1x8x128xf32, #tpu.memory_space<vmem>>, vector<1x8x128xf32>
    %1 = vector.shape_cast %0 : vector<1x8x128xf32> to vector<8x128xf32>
    %c0_2 = arith.constant 0 : index
    %c0_3 = arith.constant 0 : index
    %c0_4 = arith.constant 0 : index
    %2 = vector.load %arg3[%c0_2, %c0_3, %c0_4] : memref<1x8x128xf32, #tpu.memory_space<vmem>>, vector<1x8x128xf32>
    %3 = vector.shape_cast %2 : vector<1x8x128xf32> to vector<8x128xf32>
    %4 = tpu.concatenate %1, %3 in 1 : vector<8x128xf32>, vector<8x128xf32> -> vector<8x256xf32>
    %5 = vector.extract_strided_slice %4 {offsets = [0, 0], sizes = [8, 128], strides = [1, 1]} : vector<8x256xf32> to vector<8x128xf32>
    %6 = vector.extract_strided_slice %4 {offsets = [0, 1], sizes = [8, 128], strides = [1, 1]} : vector<8x256xf32> to vector<8x128xf32>
    %7 = vector.extract_strided_slice %4 {offsets = [0, 2], sizes = [8, 128], strides = [1, 1]} : vector<8x256xf32> to vector<8x128xf32>
    %8 = tpu.concatenate %5, %6, %7 in 0 : vector<8x128xf32>, vector<8x128xf32>, vector<8x128xf32> -> vector<24x128xf32>
    %c0_5 = arith.constant 0 : index
    %c0_6 = arith.constant 0 : index
    %9 = vector.load %arg4[%c0_5, %c0_6] : memref<16x24xf32, #tpu.memory_space<vmem>>, vector<16x24xf32>
    %cst = arith.constant dense<0.000000e+00> : vector<16x128xf32>
    %10 = tpu.matmul %9, %8, %cst {dimension_numbers = #tpu.dot_dimension_numbers<[1], [0], [0], [1], [0, 0, 1, 1], [], []>} : vector<16x24xf32>, vector<24x128xf32>, vector<16x128xf32> -> vector<16x128xf32>
    %c0_7 = arith.constant 0 : index
    %c0_8 = arith.constant 0 : index
    %11 = vector.load %arg5[%c0_7, %c0_8] : memref<16x1xf32, #tpu.memory_space<vmem>>, vector<16x1xf32>
    %12 = vector.broadcast %11 : vector<16x1xf32> to vector<16x128xf32>
    %13 = arith.addf %10, %12 : vector<16x128xf32>
    %14 = vector.extract_strided_slice %13 {offsets = [8, 0], sizes = [8, 128], strides = [1, 1]} : vector<16x128xf32> to vector<8x128xf32>
    %15 = arith.negf %14 : vector<8x128xf32>
    %16 = math.exp %15 : vector<8x128xf32>
    %cst_9 = arith.constant 1.000000e+00 : f32
    %17 = vector.broadcast %cst_9 : f32 to vector<8x128xf32>
    %18 = arith.addf %17, %16 : vector<8x128xf32>
    %19 = arith.divf %17, %18 : vector<8x128xf32>
    %20 = vector.extract_strided_slice %13 {offsets = [0, 0], sizes = [8, 128], strides = [1, 1]} : vector<16x128xf32> to vector<8x128xf32>
    %21 = arith.mulf %20, %19 : vector<8x128xf32>
    %c0_10 = arith.constant 0 : index
    %c0_11 = arith.constant 0 : index
    %c0_12 = arith.constant 0 : index
    %22 = vector.load %arg6[%c0_10, %c0_11, %c0_12] : memref<1x8x128xf32, #tpu.memory_space<vmem>>, vector<1x8x128xf32>
    %23 = vector.shape_cast %22 : vector<1x8x128xf32> to vector<8x128xf32>
    %24 = vector.shape_cast %21 : vector<8x128xf32> to vector<1x8x128xf32>
    tpu.vector_store %arg6[%c0_10, %c0_11, %c0_12], %24 {strides = array<i32>} : memref<1x8x128xf32, #tpu.memory_space<vmem>>, vector<1x8x128xf32>,
    return
  }
  func.func @transform_0(%arg0: i32, %arg1: i32) -> (i32, i32, i32) {
    %c0_i32 = arith.constant 0 : i32
    %c0_i32_0 = arith.constant 0 : i32
    return %arg0, %c0_i32, %arg1 : i32, i32, i32
  }
  func.func @transform_1(%arg0: i32, %arg1: i32) -> (i32, i32, i32) {
    %c1_i32 = arith.constant 1 : i32
    %0 = arith.addi %arg1, %c1_i32 : i32
    %c1_i32_0 = arith.constant 1 : i32
    %1 = arith.muli %0, %c1_i32_0 : i32
    %c0_i32 = arith.constant 0 : i32
    %c0_i32_1 = arith.constant 0 : i32
    return %arg0, %c0_i32, %1 : i32, i32, i32
  }
  func.func @transform_2(%arg0: i32, %arg1: i32) -> (i32, i32) {
    %c0_i32 = arith.constant 0 : i32
    %c0_i32_0 = arith.constant 0 : i32
    %c0_i32_1 = arith.constant 0 : i32
    return %c0_i32, %c0_i32_0 : i32, i32
  }
  func.func @transform_3(%arg0: i32, %arg1: i32) -> (i32, i32) {
    %c0_i32 = arith.constant 0 : i32
    %c0_i32_0 = arith.constant 0 : i32
    %c0_i32_1 = arith.constant 0 : i32
    return %c0_i32, %c0_i32_0 : i32, i32
  }
  func.func @transform_4(%arg0: i32, %arg1: i32) -> (i32, i32, i32) {
    %c0_i32 = arith.constant 0 : i32
    %c0_i32_0 = arith.constant 0 : i32
    return %arg0, %c0_i32, %arg1 : i32, i32, i32
  }
}

</mosaic_0001>

<bundles_post_ra>
// kernel: gconv1d_forward.1
= control target key start
LH: loop header
LB: loop body
LE: loop exit
PB: predicated region body
PF: predicated region fallthrough
CT: control target
= control target key end

     0   :  { %9 = vsyncpa [#allocation3], 0  ;;  %s834_s0 = inlined_call_operand.vmem [shape: f32[2,8,256], index: 0, kind: input, shape index: {}, may-alias: {0,1}]   ;;  %s835_s1 = inlined_call_operand.vmem [shape: f32[2,8,256], index: 1, kind: input, shape index: {}, may-alias: {0,1}]   ;;  %s836_s2 = inlined_call_operand.vmem [shape: f32[16,24], index: 2, kind: input, shape index: {}]   ;;  %s837_s3 = inlined_call_operand.vmem [shape: f32[16,1], index: 3, kind: input, shape index: {}]   ;;  %s838_s4 = inlined_call_operand.hbm [shape: f32[2,8,128], index: 4, kind: output, shape index: {}]  }
   0x1   :  { %11 = vsyncpa [#allocation3 + $0x1], 0  ;;  %s705_s15 = smov 0   ;;  %s707_s16 = smov 0  }
   0x2   :  { %s709_s17 = smov 0   ;;  %s711_s18 = smov 0  }
   0x3   :  { %s713_s19 = smov 0   ;;  %s715_s20 = smov 0  }
   0x4 LB: > { %s488_s21 = sadd.s32 4294967295, %s674_s20   ;;  %s489_s22 = sadd.s32 4294967294, %s674_s20   ;;  %s674_s20 = sphi %s715_s20, %s17_s20   ;;  %s670_s19 = sphi %s713_s19, %s845_s19   ;;  %s666_s18 = sphi %s711_s18, %s844_s18   ;;  %s662_s17 = sphi %s709_s17, %s843_s17   ;;  %s658_s16 = sphi %s707_s16, %s842_s16   ;;  %s654_s15 = sphi %s705_s15, %s841_s15  }
   0x5   : > { %s29_s23 = sadd.s32 1, %s670_s19  ;;  %s138_s24 = sadd.s32 1, %s662_s17 }
   0x6   : > { %p31_p0 = scmp.ge.s32.totalorder %s29_s23, 2  ;;  %p148_p1 = scmp.ne.s32.totalorder %s662_s17, %s658_s16 }
   0x7   : > { %p149_p2 = scmp.eq.s32.totalorder %s488_s21, 1  ;;  %p154_p3 = scmp.ne.s32.totalorder %s658_s16, %s654_s15 }
   0x8   : > { %s847_s23 = smov (%p31_p0, %s29_s23), 0  ;;  %p155_p5 = scmp.eq.s32.totalorder %s489_s22, 1 }
   0x9   : > { %p745_p4 = por %p149_p2, %p148_p1  ;;  %s133_s26 = ssub.s32 %s670_s19, %s847_s23 }
   0xa   : > { %p492_p6 = scmp.ge.s32.totalorder %s674_s20, 1  ;;  %p136_p7 = scmp.eq.s32.totalorder %s133_s26, 0 }
   0xb   : > { %p752_p8 = por %p155_p5, %p154_p3  ;;  %p203_p9 = scmp.lt.s32.totalorder %s674_s20, 3 }
   0xc   : > { %s758_s28 = scalar_select %p136_p7, %s662_s17, %s138_s24  }
   0xd   : > { %p204_p10 = pnand %p492_p6, %p203_p9 }
   0xe   : > { %p241_p11 = scmp.lt.s32.totalorder (!%p204_p10), %s666_s18, 1  ;;  %v277_v1 = vld [vmem:[%s836_s2] sm:$0xff] (!%p204_p10)  ;;  %vm291_vm0 = vcmask (!%p204_p10), 195584   ;;  %s676_s14 = smov (!%p204_p10), 126   ;;  %v677_v4 = vmov (!%p204_p10), 0   ;;  %v280_v5 = vld [vmem:[%s837_s3 + $0x8] sm:$0xff] (!%p204_p10) }
   0xf   : > { %207 = sbr.rel (%p204_p10) target bundleno = 412 (0x19c), region = 36  ;;  %520 = vmatprep.mubr.msk.f32.mxu0 (!%p204_p10), %vm291_vm0, %v277_v1  ;;  %590 = vset.pattern.permute.xlu1 (!%p204_p10), %v677_v4  ;;  %s678_s24 = smov (!%p204_p10), 127   ;;  %v279_v6 = vld [vmem:[%s837_s3] sm:$0xff] (!%p204_p10)  ;;  %vm267_vm1 = vcmask (!%p204_p10), 1039360   ;;  %vm274_vm2 = vcmask (!%p204_p10), 1031168   ;;  %v278_v15 = vld [vmem:[%s836_s2 + $0x8] sm:$0xff] (!%p204_p10) }
  0x10   : > { %591 = vset.pattern.permute.xlu0 (!%p204_p10), %v677_v4  ;;  %s238_s6 = sand.u32 (!%p204_p10), 1, %s658_s16  }
  0x16   : > { %s242_s29 = scalar_select %p241_p11, %s666_s18, 1 }
  0x18   : > { %s505_s30 = sshll.u32 %s242_s29, 4 }
  0x19   : > { %s248_s7 = scalar_lea.vmem %s834_s0, %s505_s30  ;;  %s507_s8 = sadd.s32 8, %s505_s30 }
  0x1a   : > { %s257_s11 = scalar_lea.vmem %s835_s1, %s507_s8  ;;  %v259_v0 = vld [vmem:[%s248_s7] sm:$0xff]  ;;  %s493_s7 = sshll.u32 %s238_s6, 3 }
  0x1b   : > { %v260_v2 = vld [vmem:[%s257_s11] sm:$0xff]  ;;  %s502_s8 = sshll.u32 %s666_s18, 7  ;;  %s240_s9 = scalar_lea.vmem [#allocation2], %s493_s7 }
  0x1c   : > { %v585_v3 = vpack.i.bf16 %v260_v2, %v259_v0  ;;  %272 = vrot.lane.b32.xlu1 %v260_v2, %s676_s14  ;;  %s396_s10 = sshll.u32 %s240_s9, 4  ;;  %s787_s13 = scalar_lea.hbm %s838_s4, %s502_s8  ;;  %s789_s10 = int_to_ptr.vmem [resolvable:$true] %s396_s10 }
  0x1d   : > { %s596_s21 = scalar_lea.vmem %s789_s10, 128  ;;  %s679_s18 = smov [#allocation2]  }
  0x1e   : > { %586 = vrot.lane.b32.xlu0 %v585_v3, %s678_s24  ;;  %p597_p12 = scmp.ne.s32.totalorder %s789_s10, %s596_s21  ;;  %s600_s22 = sshll.u32 %s679_s18, 4  ;;  %s601_s22 = int_to_ptr.vmem [resolvable:$false] %s600_s22 }
  0x1f   : > { %s602_s24 = scalar_lea.vmem %s601_s22, 256  ;;  %p603_p1 = scmp.lt.s32.totalorder %s789_s10, %s601_s22 }
  0x20   : > { %288 = vperm.xlu1 %590, %v280_v5   ;;  %p598_p13 = pnand %p597_p12, %p745_p4  ;;  %p604_p2 = scmp.lt.s32.totalorder %s602_s24, %s596_s21 }
  0x22   : > { %270 = vrot.lane.b32.xlu0 %v259_v0, %s676_s14  ;;  %s382_s14 = scalar_lea.sflag [#allocation3], %s238_s6  ;;  %p599_p0 = pneg %p598_p13 }
  0x23   : > { %p605_p3 = por %p604_p2, %p603_p1 }
  0x25   : > { %p606_p5 = pnand %p605_p3, %p599_p0 }
  0x26   : > { %283 = vperm.xlu0 %591, %v279_v6  }
  0x8e   : > { %v273_v10 = vpop.permute.xlu1 %272 }
  0x90   : > { %v587_v7 = vpop.permute.xlu0 %586 }
  0x91   : > { %v589_v8 = vunpack.i.h.bf16 %v587_v7  ;;  %v588_v9 = vunpack.i.l.bf16 %v587_v7 }
  0x93   : > { %v268_v11 = vsel %vm267_vm1, %v588_v9, %v589_v8 }
  0x94   : > { %v523_v12 = vpack.c.bf16 %v268_v11, %v259_v0  ;;  %v271_v13 = vpop.permute.xlu0 %270 }
  0x95   : > { %v275_v14 = vsel %vm274_vm2, %v271_v13, %v273_v10 }
  0x96   : > { %524 = vmatprep.subr.bf16.mxu0 %v523_v12 }
  0x97   : > { %526 = vmatpush3.bf16.msra.mxu0 %v523_v12 }
  0x98   : > { %518 = vmatprep.subr.mxu0 %v275_v14 }
  0x9b   : > { %519 = vmatpush3.msra.mxu0 %v275_v14 }
  0x9c   : > { %521 = vmatmul.mubr.msk.f32.vlgmr.msra.gmra.mrb[0].mxu0 %vm291_vm0, %v278_v15 }
  0x9f   : > { %v289_v16 = vpop.permute.xlu1 %288 }
  0xa5   : > { %v284_v23 = vpop.permute.xlu0 %283 }
 0x16f   : > { %v522_v17 = vpop.f32.mrb[0].mxu0 }
 0x170   : > { %v370_v18 = vadd.f32 %v522_v17, %v289_v16  ;;  %v364_v19 = vpop.f32.mrb[1].mxu0 }
 0x171   : > { %v365_v24 = vadd.f32 %v364_v19, %v284_v23 }
 0x172   : > { %v500_v20 = vmul.f32 -1.442695, %v370_v18 }
 0x174   : > { %592 = vpow2.f32 %v500_v20 }
 0x17e   : > { %v593_v21 = vpop.eup %592 }
 0x17f   : > { %v376_v22 = vadd.f32 1.0, %v593_v21 }
 0x181   : > { %594 = vrcp.f32 %v376_v22 }
 0x18b   : > { %v595_v25 = vpop.eup %594 }
 0x18c   : > { %v379_v26 = vmul.f32 %v595_v25, %v365_v24 }
 0x18e   : > { %380 = vst [vmem:[%s240_s9] sm:$0xff] %v379_v26 }
 0x18f   : > { %609 = shalt.err (!%p606_p5)
}
 0x190   : > { %s610_s26 = scalar_lea.hbm %s787_s13, 128  ;;  %s614_s5 = scalar_lea.hbm %s838_s4, 256 }
 0x191   : > { %p611_p6 = scmp.ne.s32.totalorder %s787_s13, %s610_s26  ;;  %p615_p10 = scmp.lt.u32.totalorder %s787_s13, %s838_s4 }
 0x192   : > { %p616_p11 = scmp.lt.u32.totalorder %s614_s5, %s610_s26  ;;  %p618_p13 = scmp.lt.u32.totalorder %s610_s26, %s787_s13 }
 0x193   : > { %p612_p7 = pnand %p611_p6, %p745_p4 }
 0x194   : > { %p617_p12 = por %p616_p11, %p615_p10 }
 0x195   : > { %p613_p9 = pneg %p612_p7 }
 0x196   : > { %p619_p0 = por %p618_p13, %p617_p12 }
 0x198   : > { %p620_p1 = pnand %p619_p0, %p613_p9 }
 0x19a   : > { %623 = shalt.err (!%p620_p1)
}
 0x19b   : > { %527 = dma.vmem_to_hbm [thread:$0]  (%p745_p4), %s789_s10, 128, %s787_s13, %s382_s14  }
 0x19c PF: > { %p533_p2 = scmp.ge.s32.totalorder %s674_s20, 2  ;;  %s408_s8 = sand.u32 1, %s654_s15  }
 0x19d   : > { %s409_s9 = scalar_lea.sflag [#allocation3], %s408_s8 }
 0x19e   : > { %p530_p3 = pnand %p533_p2, %p752_p8 }
 0x1a0   : > { %649 = dma.done.wait (!%p530_p3), %s409_s9, 128  }
 0x1a1   : > { %651 = vsyncadd (!%p530_p3), %s409_s9, 4294967168  ;;  %s17_s20 = sadd.s32 1, %s674_s20   ;;  %s841_s15 = smov %s658_s16 }
 0x1a2   : > { %p14_p5 = scmp.ge.s32.totalorder %s17_s20, 4   ;;  %s842_s16 = smov %s662_s17 }
 0x1a3   : > { %s843_s17 = smov %s758_s28  ;;  %s844_s18 = smov %s670_s19 }
 0x1a4   : > { %s845_s19 = smov %s847_s23  ;;  %16 = sbr.rel (!%p14_p5) target bundleno = 4 (0x4), region = 74 }
 0x1ab   :  { %414 = vsyncpa [#allocation3], 1 }
 0x1ac   :  { %416 = vsyncpa [#allocation3 + $0x1], 1 }

</bundles_post_ra>
